<compile_context>
chip_gen: v6e
topology: v6e:2x2x1
jax: 0.10.0
libtpu: 0.0.40
codegen_flags: <defaults>
</compile_context>

<pallas_src>
import functools

import jax
import jax.numpy as jnp
from jax.experimental import pallas as pl
from jax.experimental.pallas import tpu as pltpu


def _round_up(x, m):
    return (x + m - 1) // m * m


def maskmlp_kernel(x_ref, mask_ref, w1_ref, b1_ref, w2_ref, b2_ref, *out_refs,
                   matmul_dtype, packed_out):
    tb = x_ref.shape[0]
    out_dim = w2_ref.shape[1]
    mm_dtype = jnp.dtype(matmul_dtype)

    x = x_ref[...].astype(jnp.float32)                      # (tb, in_dim)
    m = jax.nn.sigmoid(mask_ref[...].astype(jnp.float32))   # (1, in_dim)

    # Masked + counterfactual rows stacked as a value (no VMEM scratch round-trip).
    xm = x * m                                              # torch.mul(x, mask)
    z = jnp.concatenate([xm, x - xm], axis=0)               # (2*tb, in_dim), f32 residual

    zc = z if mm_dtype == z.dtype else z.astype(mm_dtype)
    h = jnp.dot(zc, w1_ref[...], preferred_element_type=jnp.float32)
    h = jnp.maximum(h + b1_ref[...].astype(jnp.float32), 0.0)   # bias + ReLU in f32
    hc = h if mm_dtype == h.dtype else h.astype(mm_dtype)
    o = jnp.dot(hc, w2_ref[...], preferred_element_type=jnp.float32)
    o = o + b2_ref[...].astype(jnp.float32) + z                  # bias + residual in f32

    if packed_out:
        # Single store of a lane-concatenated (tb, 2*out_dim) block
        # (only used when out_dim < 128).
        out_ref, = out_refs
        out_ref[...] = jnp.concatenate([o[:tb], o[tb:]], axis=1).astype(out_ref.dtype)
    else:
        y_ref, cf_ref = out_refs
        y_ref[...] = o[:tb].astype(y_ref.dtype)
        cf_ref[...] = o[tb:].astype(cf_ref.dtype)


def _const_spec(shape):
    """Grid-invariant operand spec; single-buffered when the API supports it."""
    def idx(i):
        return (0, 0)
    buffered = getattr(pl, "Buffered", None)
    if buffered is not None:
        try:
            return pl.BlockSpec(shape, idx, pipeline_mode=buffered(1))
        except TypeError:
            pass
    return pl.BlockSpec(shape, idx)


def _vmem_estimate(tb, in_dim, hidden, out_dim, x_item, mm_item, out_item):
    two_tb = 2 * tb
    est = (
        2 * tb * in_dim * x_item                         # x tile, double-buffered
        + 2 * two_tb * out_dim * out_item                # output tiles, double-buffered
        + in_dim * 4 + (hidden + out_dim) * 4            # mask + biases (single-buffered)
        + (in_dim * hidden + hidden * out_dim) * mm_item  # w1 + w2 (single-buffered)
        + two_tb * in_dim * 4                            # z
        + two_tb * hidden * 4                            # h
        + two_tb * out_dim * 4                           # o
        + two_tb * out_dim * 4                           # concat / store temp
    )
    if mm_item != 4:
        est += two_tb * in_dim * mm_item + two_tb * hidden * mm_item  # zc, hc
    return est


def maskmlp_forward(x, mask, w1, b1, w2, b2, *, block_rows=512,
                    matmul_dtype=None, cast_x=False):
    """Returns (y, cf_y), matching MaskMLP.forward with use_residual=True."""
    B, in_dim = x.shape
    hidden = w1.shape[1]
    out_dim = w2.shape[1]
    assert in_dim == out_dim, "use_residual=True requires in_dim == out_dim"

    # Auto dtype: bf16 when every matmul dim is MXU-wide, f32 for tiny dims
    # (v5e especially: casting tiny operands is pure VPU cost with no MXU win).
    if matmul_dtype is None:
        matmul_dtype = (jnp.bfloat16 if min(in_dim, hidden, out_dim) >= 128
                        else jnp.float32)
    mm_dtype = jnp.dtype(matmul_dtype)

    # Hardware-aware VMEM cap (~48 MiB on v7x's 64 MiB, ~96 MiB on v5e/v6e).
    try:
        vmem_cap = int(pltpu.get_tpu_info().vmem_capacity_bytes)
    except Exception:
        vmem_cap = 128 << 20
    cap = min(vmem_cap * 3 // 4, 96 << 20)

    # Cast weights once in the wrapper (halves weight DMA/VMEM when bf16).
    w1c = w1 if w1.dtype == mm_dtype else w1.astype(mm_dtype)
    w2c = w2 if w2.dtype == mm_dtype else w2.astype(mm_dtype)
    # Keep small params 2D for TPU layout; biases/mask stay in their dtype (f32 math in-kernel).
    mask2 = mask.reshape(1, in_dim)
    b1_2 = b1.reshape(1, hidden)
    b2_2 = b2.reshape(1, out_dim)
    # Opt-in: stream x in the matmul dtype (halves x DMA; residual from cast x).
    if cast_x and x.dtype != mm_dtype:
        x = x.astype(mm_dtype)

    x_item = jnp.dtype(x.dtype).itemsize
    out_item = x_item
    mm_item = mm_dtype.itemsize

    # Row tile: multiple of 8, capped at padded batch, shrunk to fit the VMEM cap.
    tb = int(min(_round_up(block_rows, 8), _round_up(B, 8)))
    while tb > 64 and _vmem_estimate(tb, in_dim, hidden, out_dim,
                                     x_item, mm_item, out_item) > cap:
        tb = _round_up(max(64, tb // 2), 8)
    # Guarantee >= 2 grid steps when possible (v7x has 2 TensorCores).
    if _round_up(B, tb) // tb < 2 and _round_up(B, 8) > 8:
        tb = min(tb, _round_up(pl.cdiv(B, 2), 8))

    B_pad = _round_up(B, tb)
    if B_pad != B:
        x = jnp.pad(x, ((0, B_pad - B), (0, 0)))
    grid = (B_pad // tb,)

    est = _vmem_estimate(tb, in_dim, hidden, out_dim, x_item, mm_item, out_item)
    vmem_limit = int(min(max(est * 5 // 4 + (4 << 20), 16 << 20), cap))

    # Output layout: two full-lane outputs when out_dim >= 128 (no post-kernel
    # slice copies); lane-packed single output when out_dim < 128.
    packed_out = out_dim < 128
    if packed_out:
        out_shape = jax.ShapeDtypeStruct((B_pad, 2 * out_dim), x.dtype)
        out_specs = pl.BlockSpec((tb, 2 * out_dim), lambda i: (i, 0))
    else:
        out_shape = (jax.ShapeDtypeStruct((B_pad, out_dim), x.dtype),
                     jax.ShapeDtypeStruct((B_pad, out_dim), x.dtype))
        out_specs = [pl.BlockSpec((tb, out_dim), lambda i: (i, 0)),
                     pl.BlockSpec((tb, out_dim), lambda i: (i, 0))]

    result = pl.pallas_call(
        functools.partial(maskmlp_kernel, matmul_dtype=mm_dtype,
                          packed_out=packed_out),
        out_shape=out_shape,
        grid_spec=pltpu.PrefetchScalarGridSpec(
            num_scalar_prefetch=0,
            grid=grid,
            in_specs=[
                pl.BlockSpec((tb, in_dim), lambda i: (i, 0)),  # x tile (streamed)
                _const_spec((1, in_dim)),                      # mask
                _const_spec((in_dim, hidden)),                 # w1 (matmul dtype)
                _const_spec((1, hidden)),                      # b1
                _const_spec((hidden, out_dim)),                # w2 (matmul dtype)
                _const_spec((1, out_dim)),                     # b2
            ],
            out_specs=out_specs,
        ),
        compiler_params=pltpu.CompilerParams(
            dimension_semantics=("parallel",),
            vmem_limit_bytes=vmem_limit,
        ),
    )(x, mask2, w1c, b1_2, w2c, b2_2)

    if packed_out:
        y = result[:B, 0:out_dim]
        cf_y = result[:B, out_dim:2 * out_dim]
    else:
        y, cf_y = result
        y, cf_y = y[:B], cf_y[:B]
    return y, cf_y


def reference_forward(x, mask, w1, b1, w2, b2):
    m = jax.nn.sigmoid(mask.reshape(1, -1))
    x_masked = x * m
    x_cf = x * (1.0 - m)

    def mlp(z):
        h = jnp.maximum(
            jnp.dot(z, w1, precision=jax.lax.Precision.HIGHEST) + b1.reshape(1, -1),
            0.0)
        return jnp.dot(h, w2, precision=jax.lax.Precision.HIGHEST) + b2.reshape(1, -1)

    return mlp(x_masked) + x_masked, mlp(x_cf) + x_cf


if __name__ == "__main__":
    # Small shapes consistent with the module: in_dim == out_dim (residual),
    # hidden = 2*in_dim.  B=50 deliberately isn't a multiple of the row tile
    # (exercises the padded ragged-batch path).
    B, in_dim, hidden = 50, 32, 64
    out_dim = in_dim

    key = jax.random.PRNGKey(0)
    kx, km, kw1, kb1, kw2, kb2 = jax.random.split(key, 6)

    x = jax.random.normal(kx, (B, in_dim), dtype=jnp.float32)
    mask = jax.random.normal(km, (in_dim,), dtype=jnp.float32) * 0.5
    # Linear params stored transposed: (in_features, out_features).
    w1 = jax.random.normal(kw1, (in_dim, hidden), dtype=jnp.float32) * 0.1
    b1 = jax.random.normal(kb1, (hidden,), dtype=jnp.float32) * 0.1
    w2 = jax.random.normal(kw2, (hidden, out_dim), dtype=jnp.float32) * 0.1
    b2 = jax.random.normal(kb2, (out_dim,), dtype=jnp.float32) * 0.1

    y_ref, cf_ref = reference_forward(x, mask, w1, b1, w2, b2)

    # Default path: auto dtype (f32 for these tiny dims), auto tiling — tb is
    # reduced so the parallel grid axis has >= 2 steps.
    y0, cf0 = maskmlp_forward(x, mask, w1, b1, w2, b2)
    jax.block_until_ready((y0, cf0))
    assert y0.shape == (B, out_dim) and cf0.shape == (B, out_dim)
    assert jnp.allclose(y0, y_ref, atol=2e-3, rtol=2e-3)
    assert jnp.allclose(cf0, cf_ref, atol=2e-3, rtol=2e-3)

    # Explicit f32 path with a small row tile (4-step grid, pipelining engaged).
    y, cf_y = maskmlp_forward(x, mask, w1, b1, w2, b2,
                              block_rows=16, matmul_dtype=jnp.float32)
    jax.block_until_ready((y, cf_y))
    assert jnp.allclose(y, y_ref, atol=2e-3, rtol=2e-3)
    assert jnp.allclose(cf_y, cf_ref, atol=2e-3, rtol=2e-3)

    # bf16 matmul-operand path (weights cast once in the wrapper), f32
    # accumulation and f32 bias/ReLU/residual; looser tolerance from bf16.
    yb, cfb = maskmlp_forward(x, mask, w1, b1, w2, b2,
                              block_rows=16, matmul_dtype=jnp.bfloat16)
    jax.block_until_ready((yb, cfb))
    assert jnp.allclose(yb, y_ref, atol=5e-2, rtol=5e-2)
    assert jnp.allclose(cfb, cf_ref, atol=5e-2, rtol=5e-2)

    print("KERNEL_OK")
</pallas_src>

<mosaic_0001>
module attributes {stable_mosaic.version = 11 : i64} {
  func.func @maskmlp_kernel(%arg0: i32, %arg1: memref<32x32xf32, #tpu.memory_space<vmem>>, %arg2: memref<1x32xf32, #tpu.memory_space<vmem>>, %arg3: memref<32x64xf32, #tpu.memory_space<vmem>>, %arg4: memref<1x64xf32, #tpu.memory_space<vmem>>, %arg5: memref<64x32xf32, #tpu.memory_space<vmem>>, %arg6: memref<1x32xf32, #tpu.memory_space<vmem>>, %arg7: memref<32x64xf32, #tpu.memory_space<vmem>>) attributes {dimension_semantics = [#tpu.dimension_semantics<parallel>], iteration_bounds = array<i64: 2>, scalar_prefetch = 0 : i64, scratch_operands = 0 : i64, tpu.core_type = #tpu.core_type<tc>, window_params = [{transform_indices = @transform_0, window_bounds = array<i64: 32, 32>}, {pipeline_mode = #tpu.pipeline_mode<synchronous>, transform_indices = @transform_1, window_bounds = array<i64: 1, 32>}, {pipeline_mode = #tpu.pipeline_mode<synchronous>, transform_indices = @transform_2, window_bounds = array<i64: 32, 64>}, {pipeline_mode = #tpu.pipeline_mode<synchronous>, transform_indices = @transform_3, window_bounds = array<i64: 1, 64>}, {pipeline_mode = #tpu.pipeline_mode<synchronous>, transform_indices = @transform_4, window_bounds = array<i64: 64, 32>}, {pipeline_mode = #tpu.pipeline_mode<synchronous>, transform_indices = @transform_5, window_bounds = array<i64: 1, 32>}, {transform_indices = @transform_6, window_bounds = array<i64: 32, 64>}]} {
    %c0 = arith.constant 0 : index
    %c0_0 = arith.constant 0 : index
    %0 = vector.load %arg1[%c0, %c0_0] : memref<32x32xf32, #tpu.memory_space<vmem>>, vector<32x32xf32>
    %c0_1 = arith.constant 0 : index
    %c0_2 = arith.constant 0 : index
    %1 = vector.load %arg2[%c0_1, %c0_2] : memref<1x32xf32, #tpu.memory_space<vmem>>, vector<1x32xf32>
    %2 = arith.negf %1 : vector<1x32xf32>
    %3 = math.exp %2 : vector<1x32xf32>
    %cst = arith.constant 1.000000e+00 : f32
    %4 = vector.broadcast %cst : f32 to vector<1x32xf32>
    %5 = arith.addf %4, %3 : vector<1x32xf32>
    %6 = arith.divf %4, %5 : vector<1x32xf32>
    %7 = vector.broadcast %6 : vector<1x32xf32> to vector<32x32xf32>
    %8 = arith.mulf %0, %7 : vector<32x32xf32>
    %9 = arith.subf %0, %8 : vector<32x32xf32>
    %10 = tpu.concatenate %8, %9 in 0 : vector<32x32xf32>, vector<32x32xf32> -> vector<64x32xf32>
    %c0_3 = arith.constant 0 : index
    %c0_4 = arith.constant 0 : index
    %11 = vector.load %arg3[%c0_3, %c0_4] : memref<32x64xf32, #tpu.memory_space<vmem>>, vector<32x64xf32>
    %cst_5 = arith.constant dense<0.000000e+00> : vector<64x64xf32>
    %12 = tpu.matmul %10, %11, %cst_5 {dimension_numbers = #tpu.dot_dimension_numbers<[1], [0], [0], [1], [0, 0, 1, 1], [], []>} : vector<64x32xf32>, vector<32x64xf32>, vector<64x64xf32> -> vector<64x64xf32>
    %c0_6 = arith.constant 0 : index
    %c0_7 = arith.constant 0 : index
    %13 = vector.load %arg4[%c0_6, %c0_7] : memref<1x64xf32, #tpu.memory_space<vmem>>, vector<1x64xf32>
    %14 = vector.broadcast %13 : vector<1x64xf32> to vector<64x64xf32>
    %15 = arith.addf %12, %14 : vector<64x64xf32>
    %cst_8 = arith.constant 0.000000e+00 : f32
    %16 = vector.broadcast %cst_8 : f32 to vector<64x64xf32>
    %17 = arith.maximumf %15, %16 : vector<64x64xf32>
    %c0_9 = arith.constant 0 : index
    %c0_10 = arith.constant 0 : index
    %18 = vector.load %arg5[%c0_9, %c0_10] : memref<64x32xf32, #tpu.memory_space<vmem>>, vector<64x32xf32>
    %cst_11 = arith.constant dense<0.000000e+00> : vector<64x32xf32>
    %19 = tpu.matmul %17, %18, %cst_11 {dimension_numbers = #tpu.dot_dimension_numbers<[1], [0], [0], [1], [0, 0, 1, 1], [], []>} : vector<64x64xf32>, vector<64x32xf32>, vector<64x32xf32> -> vector<64x32xf32>
    %c0_12 = arith.constant 0 : index
    %c0_13 = arith.constant 0 : index
    %20 = vector.load %arg6[%c0_12, %c0_13] : memref<1x32xf32, #tpu.memory_space<vmem>>, vector<1x32xf32>
    %21 = vector.broadcast %20 : vector<1x32xf32> to vector<64x32xf32>
    %22 = arith.addf %19, %21 : vector<64x32xf32>
    %23 = arith.addf %22, %10 : vector<64x32xf32>
    %24 = vector.extract_strided_slice %23 {offsets = [0, 0], sizes = [32, 32], strides = [1, 1]} : vector<64x32xf32> to vector<32x32xf32>
    %25 = vector.extract_strided_slice %23 {offsets = [32, 0], sizes = [32, 32], strides = [1, 1]} : vector<64x32xf32> to vector<32x32xf32>
    %26 = tpu.concatenate %24, %25 in 1 : vector<32x32xf32>, vector<32x32xf32> -> vector<32x64xf32>
    %c0_14 = arith.constant 0 : index
    %c0_15 = arith.constant 0 : index
    %27 = vector.load %arg7[%c0_14, %c0_15] : memref<32x64xf32, #tpu.memory_space<vmem>>, vector<32x64xf32>
    tpu.vector_store %arg7[%c0_14, %c0_15], %26 {strides = array<i32>} : memref<32x64xf32, #tpu.memory_space<vmem>>, vector<32x64xf32>,
    return
  }
  func.func @transform_0(%arg0: i32) -> (i32, i32) {
    %c0_i32 = arith.constant 0 : i32
    %c0_i32_0 = arith.constant 0 : i32
    return %arg0, %c0_i32 : i32, i32
  }
  func.func @transform_1(%arg0: i32) -> (i32, i32) {
    %c0_i32 = arith.constant 0 : i32
    %c0_i32_0 = arith.constant 0 : i32
    %c0_i32_1 = arith.constant 0 : i32
    return %c0_i32, %c0_i32_0 : i32, i32
  }
  func.func @transform_2(%arg0: i32) -> (i32, i32) {
    %c0_i32 = arith.constant 0 : i32
    %c0_i32_0 = arith.constant 0 : i32
    %c0_i32_1 = arith.constant 0 : i32
    return %c0_i32, %c0_i32_0 : i32, i32
  }
  func.func @transform_3(%arg0: i32) -> (i32, i32) {
    %c0_i32 = arith.constant 0 : i32
    %c0_i32_0 = arith.constant 0 : i32
    %c0_i32_1 = arith.constant 0 : i32
    return %c0_i32, %c0_i32_0 : i32, i32
  }
  func.func @transform_4(%arg0: i32) -> (i32, i32) {
    %c0_i32 = arith.constant 0 : i32
    %c0_i32_0 = arith.constant 0 : i32
    %c0_i32_1 = arith.constant 0 : i32
    return %c0_i32, %c0_i32_0 : i32, i32
  }
  func.func @transform_5(%arg0: i32) -> (i32, i32) {
    %c0_i32 = arith.constant 0 : i32
    %c0_i32_0 = arith.constant 0 : i32
    %c0_i32_1 = arith.constant 0 : i32
    return %c0_i32, %c0_i32_0 : i32, i32
  }
  func.func @transform_6(%arg0: i32) -> (i32, i32) {
    %c0_i32 = arith.constant 0 : i32
    %c0_i32_0 = arith.constant 0 : i32
    return %arg0, %c0_i32 : i32, i32
  }
}

</mosaic_0001>

<bundles_post_ra>
// kernel: tpu_custom_call.1
= control target key start
LH: loop header
LB: loop body
LE: loop exit
PB: predicated region body
PF: predicated region fallthrough
CT: control target
= control target key end

     0   :  { %11 = vsyncpa [#allocation3], 0  ;;  %s1157_s0 = inlined_call_operand.vmem [shape: f32[64,32], index: 0, kind: input, shape index: {}]   ;;  %s1158_s1 = inlined_call_operand.vmem [shape: f32[1,32], index: 1, kind: input, shape index: {}]   ;;  %s1159_s2 = inlined_call_operand.vmem [shape: f32[32,64], index: 2, kind: input, shape index: {}]   ;;  %s1160_s3 = inlined_call_operand.vmem [shape: f32[1,64], index: 3, kind: input, shape index: {}]   ;;  %s1161_s4 = inlined_call_operand.vmem [shape: f32[64,32], index: 4, kind: input, shape index: {}]   ;;  %s1162_s5 = inlined_call_operand.vmem [shape: f32[1,32], index: 5, kind: input, shape index: {}]   ;;  %s1163_s6 = inlined_call_operand.hbm [shape: f32[64,64], index: 6, kind: output, shape index: {}]  }
   0x1   :  { %13 = vsyncpa [#allocation3 + $0x1], 0  ;;  %s951_s21 = smov 0   ;;  %s953_s22 = smov 0  }
   0x2   :  { %s955_s23 = smov 0   ;;  %s957_s24 = smov 0  }
   0x3 LB: > { %s972_s25 = sadd.s32 4294967295, %s910_s24   ;;  %s680_s26 = sadd.s32 4294967294, %s910_s24   ;;  %s910_s24 = sphi %s957_s24, %s1169_s24   ;;  %s906_s23 = sphi %s955_s23, %s1168_s23   ;;  %s902_s22 = sphi %s953_s22, %s1167_s22   ;;  %s898_s21 = sphi %s951_s21, %s1166_s21  }
   0x4   : > { %s976_s27 = sadd.s32 1, %s910_s24   ;;  %s157_s28 = sadd.s32 1, %s906_s23 }
   0x5   : > { %s154_s29 = ssub.s32 %s910_s24, %s976_s27  ;;  %p167_p0 = scmp.ne.s32.totalorder %s906_s23, %s902_s22 }
   0x6   : > { %p155_p1 = scmp.eq.s32.totalorder %s154_s29, 0  ;;  %p168_p2 = scmp.eq.s32.totalorder %s972_s25, 1 }
   0x7   : > { %p173_p3 = scmp.ne.s32.totalorder %s902_s22, %s898_s21  ;;  %p174_p4 = scmp.eq.s32.totalorder %s680_s26, 1 }
   0x8   : > { %s987_s30 = scalar_select %p155_p1, %s906_s23, %s157_s28  }
   0x9   : > { %p989_p5 = por %p168_p2, %p167_p0  ;;  %p993_p6 = por %p174_p4, %p173_p3 }
   0xa   : > { %p683_p7 = scmp.ge.s32.totalorder %s910_s24, 1  ;;  %p216_p8 = scmp.lt.s32.totalorder %s910_s24, 3 }
   0xc   : > { %p217_p9 = pnand %p683_p7, %p216_p8 }
   0xd   : > { %s685_s12 = sshll.u32 (!%p217_p9), %s972_s25, 2  ;;  %s912_s14 = smov (!%p217_p9), 32  }
   0xe   : > { %220 = sbr.rel (%p217_p9) target bundleno = 602 (0x25a), region = 44  ;;  %p247_p10 = scmp.lt.s32.totalorder (!%p217_p9), %s685_s12, 7 }
   0xf   : > { %s243_s15 = sand.u32 (!%p217_p9), 1, %s902_s22   ;;  %s711_s19 = sshll.u32 (!%p217_p9), %s972_s25, 9 }
  0x10   : > { %s1113_s28 = scalar_lea.hbm (!%p217_p9), %s1163_s6, %s711_s19  ;;  %s1117_s25 = scalar_lea.sflag (!%p217_p9), [#allocation3], %s243_s15 }
  0x11   : > { %s913_s9 = smov (!%p217_p9), [#allocation2]  }
  0x12   : > { %s854_s10 = sshll.u32 (!%p217_p9), %s913_s9, 4  ;;  %s855_s10 = int_to_ptr.vmem [resolvable:$false] %s854_s10 }
  0x13   : > { %v281_v0 = vld [vmem:[%s1159_s2 + $0x18] sm:$0xff]  ;;  %v280_v1 = vld [vmem:[%s1159_s2 + $0x10] sm:$0xff]  ;;  %v257_v2 = vld [vmem:[%s1158_s1] sm:$0x1]  ;;  %v265_v12 = vlaneseq  ;;  %s1171_s12 = smov (!%p247_p10, %s685_s12), 7  ;;  %vm289_vm0 = vcmask 261120  }
  0x14   : > { %740 = vmatprep.subr.mxu0 %v281_v0  ;;  %v434_v3 = vld [vmem:[%s1161_s4 + $0x38] sm:$0xff]  ;;  %v279_v4 = vld [vmem:[%s1159_s2 + $0x8] sm:$0xff]  ;;  %v687_v5 = vmul.f32 -1.442695, %v257_v2  ;;  %v433_v6 = vld [vmem:[%s1161_s4 + $0x30] sm:$0xff]  ;;  %s686_s13 = sshll.u32 %s1171_s12, 3 }
  0x15   : > { %741 = vmatpush3.msra.mxu0 %v281_v0  ;;  %788 = vmatprep.subr.mxu1 %v434_v3  ;;  %v278_v7 = vld [vmem:[%s1159_s2] sm:$0xff]  ;;  %v432_v8 = vld [vmem:[%s1161_s4 + $0x28] sm:$0xff]  ;;  %v266_v13 = vshrl.u32 %v265_v12, 7  ;;  %s250_s16 = scalar_lea.vmem %s1157_s0, %s686_s13  ;;  %v430_v29 = vld [vmem:[%s1161_s4 + $0x18] sm:$0xff]  ;;  %vm442_vm1 = vcmask 523264   ;;  %s856_s11 = scalar_lea.vmem %s855_s10, 1024 }
  0x16   : > { %742 = vmatprep.subr.mxu0 %v280_v1  ;;  %796 = vmatpush3.msra.mxu1 %v434_v3  ;;  %846 = vpow2.f32 %v687_v5  ;;  %v431_v9 = vld [vmem:[%s1161_s4 + $0x20] sm:$0xff]  ;;  %v254_v17 = vld [vmem:[%s250_s16 + $0x8] sm:$0xff]  ;;  %v255_v18 = vld [vmem:[%s250_s16 + $0x10] sm:$0xff] }
  0x17   : > { %743 = vmatpush3.msra.mxu0 %v280_v1  ;;  %789 = vmatprep.subr.mxu1 %v433_v6  ;;  %v267_v14 = vsub.s32 0, %v266_v13  ;;  %v253_v16 = vld [vmem:[%s250_s16] sm:$0xff]  ;;  %v256_v23 = vld [vmem:[%s250_s16 + $0x18] sm:$0xff]  ;;  %v429_v30 = vld [vmem:[%s1161_s4 + $0x10] sm:$0xff]  ;;  %s684_s16 = sshll.u32 %s243_s15, 5 }
  0x18   : > { %744 = vmatprep.subr.mxu0 %v279_v4  ;;  %797 = vmatpush3.msra.mxu1 %v433_v6  ;;  %v428_v31 = vld [vmem:[%s1161_s4 + $0x8] sm:$0xff]  ;;  %v427_v32 = vld [vmem:[%s1161_s4] sm:$0xff]  ;;  %s245_s17 = scalar_lea.vmem [#allocation2], %s684_s16 }
  0x19   : > { %745 = vmatpush3.msra.mxu0 %v279_v4  ;;  %790 = vmatprep.subr.mxu1 %v432_v8  ;;  %v688_v33 = vld [vmem:[%s1160_s3] ss:$0 sm:$0xff]  ;;  %s618_s18 = sshll.u32 %s245_s17, 4  ;;  %s1108_s18 = int_to_ptr.vmem [resolvable:$true] %s618_s18 }
  0x1a   : > { %746 = vmatprep.subr.mxu0 %v278_v7  ;;  %798 = vmatpush3.msra.mxu1 %v432_v8  ;;  %v697_v58 = vld [vmem:[%s1162_s5] ss:$0 sm:$0xff]  ;;  %s850_s29 = scalar_lea.vmem %s1108_s18, 512  ;;  %p857_p0 = scmp.lt.s32.totalorder %s1108_s18, %s855_s10 }
  0x1b   : > { %747 = vmatpush3.msra.mxu0 %v278_v7  ;;  %791 = vmatprep.subr.mxu1 %v431_v9  ;;  %p851_p11 = scmp.ne.s32.totalorder %s1108_s18, %s850_s29  ;;  %p858_p1 = scmp.lt.s32.totalorder %s856_s11, %s850_s29 }
  0x1c   : > { %760 = vmatprep.subr.mxu0 %v434_v3  ;;  %799 = vmatpush3.msra.mxu1 %v431_v9 }
  0x1d   : > { %792 = vmatprep.subr.mxu1 %v430_v29  ;;  %p852_p12 = pnand %p851_p11, %p989_p5  ;;  %p859_p2 = por %p858_p1, %p857_p0 }
  0x1e   : > { %800 = vmatpush3.msra.mxu1 %v430_v29 }
  0x1f   : > { %793 = vmatprep.subr.mxu1 %v429_v30  ;;  %p853_p13 = pneg %p852_p12 }
  0x20   : > { %801 = vmatpush3.msra.mxu1 %v429_v30 }
  0x21   : > { %794 = vmatprep.subr.mxu1 %v428_v31  ;;  %p860_p3 = pnand %p859_p2, %p853_p13 }
  0x22   : > { %802 = vmatpush3.msra.mxu1 %v428_v31 }
  0x23   : > { %v847_v10 = vpop.eup %846  ;;  %795 = vmatprep.subr.mxu1 %v427_v32 }
  0x24   : > { %v261_v11 = vadd.f32 1.0, %v847_v10  ;;  %803 = vmatpush3.msra.mxu1 %v427_v32 }
  0x26   : > { %848 = vrcp.f32 %v261_v11 }
  0x33   : > { %v849_v15 = vpop.eup %848 }
  0x34   : > { %v268_v19 = vrot.slane %v849_v15, %v267_v14 }
  0x36   : > { %v1030_v20 = vmul.f32 %v268_v19, %v253_v16  ;;  %v1032_v21 = vmul.f32 %v268_v19, %v254_v17  ;;  %v1034_v22 = vmul.f32 %v268_v19, %v255_v18  ;;  %v1040_v24 = vmul.f32 %v268_v19, %v256_v23 }
  0x38   : > { %748 = vmatprep.mubr.msk.f32.mxu0 %vm289_vm0, %v1030_v20  ;;  %v1043_v25 = vsub.f32 %v253_v16, %v1030_v20  ;;  %v1050_v26 = vsub.f32 %v254_v17, %v1032_v21  ;;  %v1055_v27 = vsub.f32 %v255_v18, %v1034_v22  ;;  %v1060_v28 = vsub.f32 %v256_v23, %v1040_v24 }
  0x39   : > { %749 = vmatmul.mubr.msk.f32.vlgmr.msra.gmra.mxu0 %vm289_vm0, %v1032_v21 }
  0x3a   : > { %751 = vmatprep.mubr.msk.f32.mxu0 %vm289_vm0, %v1034_v22  ;;  %761 = vmatpush3.msra.mxu0 %v434_v3 }
  0x3b   : > { %762 = vmatprep.subr.mxu0 %v433_v6 }
  0x3c   : > { %763 = vmatpush3.msra.mxu0 %v433_v6 }
  0x3d   : > { %752 = vmatmul.mubr.msk.f32.gmra.mxu0 %vm289_vm0, %v1040_v24  ;;  %764 = vmatprep.subr.mxu0 %v432_v8 }
  0x3e   : > { %754 = vmatprep.mubr.msk.f32.mxu0 %vm289_vm0, %v1043_v25  ;;  %765 = vmatpush3.msra.mxu0 %v432_v8 }
  0x3f   : > { %766 = vmatprep.subr.mxu0 %v431_v9 }
  0x40   : > { %767 = vmatpush3.msra.mxu0 %v431_v9 }
  0x41   : > { %755 = vmatmul.mubr.msk.f32.gmra.mxu0 %vm289_vm0, %v1050_v26  ;;  %768 = vmatprep.subr.mxu0 %v430_v29 }
  0x42   : > { %757 = vmatprep.mubr.msk.f32.mxu0 %vm289_vm0, %v1055_v27  ;;  %769 = vmatpush3.msra.mxu0 %v430_v29 }
  0x43   : > { %770 = vmatprep.subr.mxu0 %v429_v30 }
  0x44   : > { %771 = vmatpush3.msra.mxu0 %v429_v30 }
  0x45   : > { %758 = vmatmul.mubr.msk.f32.gmra.mxu0 %vm289_vm0, %v1060_v28  ;;  %772 = vmatprep.subr.mxu0 %v428_v31 }
  0x46   : > { %773 = vmatpush3.msra.mxu0 %v428_v31 }
  0x47   : > { %774 = vmatprep.subr.mxu0 %v427_v32 }
  0x48   : > { %775 = vmatpush3.msra.mxu0 %v427_v32 }
  0xf9   : > { %v750_v34 = vpop.f32.mrf.mxu0 }
  0xfa   : > { %v386_v35 = vadd.f32 %v750_v34, %v688_v33 }
  0xfb   : > { %v380_v36 = vpop.f32.mrf.mxu0 }
  0xfc   : > { %v381_v37 = vadd.f32 %v688_v33, %v380_v36  ;;  %v420_v40 = vmax.f32 %v386_v35, 0.0 }
  0xfd   : > { %v753_v38 = vpop.f32.mrf.mxu0 }
  0xfe   : > { %v419_v39 = vmax.f32 %v381_v37, 0.0  ;;  %v396_v41 = vadd.f32 %v753_v38, %v688_v33 }
  0xff   : > { %v390_v42 = vpop.f32.mrf.mxu0 }
 0x100   : > { %v391_v43 = vadd.f32 %v688_v33, %v390_v42  ;;  %776 = vmatprep.mubr.msk.f32.mxu0 %vm442_vm1, %v419_v39  ;;  %v422_v46 = vmax.f32 %v396_v41, 0.0 }
 0x101   : > { %v756_v44 = vpop.f32.mrf.mxu0  ;;  %777 = vmatmul.mubr.msk.f32.vlgmr.msra.gmra.mxu0 %vm442_vm1, %v420_v40 }
 0x102   : > { %v421_v45 = vmax.f32 %v391_v43, 0.0  ;;  %v406_v47 = vadd.f32 %v756_v44, %v688_v33 }
 0x103   : > { %v400_v48 = vpop.f32.mrf.mxu0 }
 0x104   : > { %v401_v49 = vadd.f32 %v688_v33, %v400_v48  ;;  %779 = vmatprep.mubr.msk.f32.mxu1 %vm442_vm1, %v421_v45  ;;  %v424_v52 = vmax.f32 %v406_v47, 0.0 }
 0x105   : > { %v759_v50 = vpop.f32.mrf.mxu0  ;;  %780 = vmatmul.mubr.msk.f32.vlgmr.msra.gmra.mxu1 %vm442_vm1, %v422_v46 }
 0x106   : > { %v423_v51 = vmax.f32 %v401_v49, 0.0  ;;  %v416_v53 = vadd.f32 %v759_v50, %v688_v33 }
 0x107   : > { %v410_v54 = vpop.f32.mrf.mxu0 }
 0x108   : > { %v411_v55 = vadd.f32 %v688_v33, %v410_v54  ;;  %782 = vmatprep.mubr.msk.f32.mxu1 %vm442_vm1, %v423_v51  ;;  %v426_v57 = vmax.f32 %v416_v53, 0.0 }
 0x109   : > { %783 = vmatmul.mubr.msk.f32.gmra.mxu1 %vm442_vm1, %v424_v52 }
 0x10a   : > { %v425_v56 = vmax.f32 %v411_v55, 0.0 }
 0x10c   : > { %785 = vmatprep.mubr.msk.f32.mxu1 %vm442_vm1, %v425_v56 }
 0x10d   : > { %786 = vmatmul.mubr.msk.f32.gmra.mxu1 %vm442_vm1, %v426_v57 }
 0x1c1   : > { %v778_v11 = vpop.f32.mrf.mxu0 }
 0x1c2   : > { %v539_v14 = vadd.f32 %v778_v11, %v697_v58 }
 0x1c3   : > { %v533_v12 = vpop.f32.mrf.mxu0 }
 0x1c4   : > { %v534_v13 = vadd.f32 %v697_v58, %v533_v12  ;;  %v573_v18 = vadd.f32 %v539_v14, %v1032_v21 }
 0x1c5   : > { %v781_v59 = vpop.f32.mrf.mxu1 }
 0x1c6   : > { %v549_v60 = vadd.f32 %v781_v59, %v697_v58  ;;  %v572_v15 = vadd.f32 %v534_v13, %v1030_v20 }
 0x1c7   : > { %v543_v61 = vpop.f32.mrf.mxu1 }
 0x1c8   : > { %v544_v62 = vadd.f32 %v697_v58, %v543_v61  ;;  %v575_v20 = vadd.f32 %v549_v60, %v1040_v24 }
 0x1c9   : > { %v784_v63 = vpop.f32.mrf.mxu1 }
 0x1ca   : > { %v559_v3 = vadd.f32 %v784_v63, %v697_v58  ;;  %v574_v19 = vadd.f32 %v544_v62, %v1034_v22 }
 0x1cb   : > { %v553_v0 = vpop.f32.mrf.mxu1 }
 0x1cc   : > { %v554_v1 = vadd.f32 %v697_v58, %v553_v0  ;;  %v577_v7 = vadd.f32 %v559_v3, %v1050_v26 }
 0x1cd   : > { %v787_v2 = vpop.f32.mrf.mxu1 }
 0x1ce   : > { %v576_v4 = vadd.f32 %v554_v1, %v1043_v25  ;;  %v569_v8 = vadd.f32 %v787_v2, %v697_v58 }
 0x1cf   : > { %v563_v5 = vpop.f32.mrf.mxu1 }
 0x1d0   : > { %v564_v6 = vadd.f32 %v697_v58, %v563_v5  ;;  %584 = vrot.lane.b32.xlu0 %v576_v4, %s912_s14  ;;  %v579_v10 = vadd.f32 %v569_v8, %v1060_v28 }
 0x1d2   : > { %v578_v9 = vadd.f32 %v564_v6, %v1055_v27 }
 0x1d4   : > { %588 = vrot.lane.b32.xlu1 %v578_v9, %s912_s14  ;;  %586 = vrot.lane.b32.xlu0 %v577_v7, %s912_s14 }
 0x1d8   : > { %590 = vrot.lane.b32.xlu1 %v579_v10, %s912_s14 }
 0x242   : > { %v585_v16 = vpop.permute.xlu0 %584 }
 0x243   : > { %v596_v17 = vsel %vm289_vm0, %v572_v15, %v585_v16 }
 0x244   : > { %600 = vst.msk [vmem:[%s245_s17] sm:$0xff] %vm442_vm1, %v596_v17 }
 0x246   : > { %v589_v23 = vpop.permute.xlu1 %588  ;;  %v587_v25 = vpop.permute.xlu0 %586 }
 0x247   : > { %v598_v26 = vsel %vm289_vm0, %v574_v19, %v589_v23  ;;  %v597_v27 = vsel %vm289_vm0, %v573_v18, %v587_v25 }
 0x248   : > { %602 = vst.msk [vmem:[%s245_s17 + $0x10] sm:$0xff] %vm442_vm1, %v598_v26  ;;  %601 = vst.msk [vmem:[%s245_s17 + $0x8] sm:$0xff] %vm442_vm1, %v597_v27 }
 0x24a   : > { %v591_v21 = vpop.permute.xlu1 %590 }
 0x24b   : > { %v599_v22 = vsel %vm289_vm0, %v575_v20, %v591_v21 }
 0x24c   : > { %603 = vst.msk [vmem:[%s245_s17 + $0x18] sm:$0xff] %vm442_vm1, %v599_v22 }
 0x24d   : > { %863 = shalt.err (!%p860_p3)
}
 0x24e   : > { %s864_s12 = scalar_lea.hbm %s1113_s28, 512  ;;  %s868_s15 = scalar_lea.hbm %s1163_s6, 1024 }
 0x24f   : > { %p865_p4 = scmp.ne.s32.totalorder %s1113_s28, %s864_s12  ;;  %p869_p9 = scmp.lt.s32.totalorder %s1113_s28, %s1163_s6 }
 0x250   : > { %p870_p10 = scmp.lt.s32.totalorder %s868_s15, %s864_s12 }
 0x251   : > { %p866_p7 = pnand %p865_p4, %p989_p5 }
 0x252   : > { %p871_p11 = por %p870_p10, %p869_p9 }
 0x253   : > { %p867_p8 = pneg %p866_p7 }
 0x255   : > { %p872_p12 = pnand %p871_p11, %p867_p8 }
 0x257   : > { %875 = shalt.err (!%p872_p12)
}
 0x258   : > { %s914_s19 = smov 128   ;;  %s915_s20 = smov 8  }
 0x259   : > { %804 = dma.vmem_to_hbm [thread:$0]  (%p989_p5), %s1108_s18, 512, %s1113_s28, %s1117_s25, %s914_s19, %s914_s19, %s915_s20  }
 0x25a PF: > { %p810_p13 = scmp.ge.s32.totalorder %s910_s24, 2  ;;  %s633_s26 = sand.u32 1, %s898_s21  }
 0x25b   : > { %s634_s29 = scalar_lea.sflag [#allocation3], %s633_s26 }
 0x25c   : > { %p807_p0 = pnand %p810_p13, %p993_p6 }
 0x25e   : > { %p808_p1 = pneg %p807_p0 }
 0x260   : > { %893 = dma.done.wait (%p808_p1), %s634_s29, 512  }
 0x261   : > { %895 = vsyncadd (%p808_p1), %s634_s29, 4294966784  ;;  %p16_p2 = scmp.ge.s32.totalorder %s976_s27, 4   ;;  %s1166_s21 = smov %s902_s22 }
 0x262   : > { %s1167_s22 = smov %s906_s23  ;;  %s1168_s23 = smov %s987_s30 }
 0x263   : > { %s1169_s24 = smov %s976_s27  ;;  %18 = sbr.rel (!%p16_p2) target bundleno = 3 (0x3), region = 79 }
 0x268   :  { %639 = vsyncpa [#allocation3], 1 }
 0x269   :  { %641 = vsyncpa [#allocation3 + $0x1], 1 }

</bundles_post_ra>
